<compile_context>
chip_gen: v5e
topology: v5e:2x2
jax: 0.10.0
libtpu: 0.0.40
codegen_flags: <defaults>
</compile_context>

<pallas_src>
import functools
import math

import jax
import jax.numpy as jnp
from jax import lax
from jax.experimental import pallas as pl
from jax.experimental.pallas import tpu as pltpu


_MIN_VMEM = 32 * 1024 * 1024
_MAX_VMEM = 128 * 1024 * 1024


def _nbytes(shape, dtype):
    n = 1
    for s in shape:
        n *= int(s)
    return n * jnp.dtype(dtype).itemsize


def _vmem_limit(tile_bytes):
    """Scoped-VMEM request: 2x (double buffering) + headroom, clamped."""
    return int(min(max(2 * tile_bytes + (2 << 20), _MIN_VMEM), _MAX_VMEM))


# ----------------------------------------------------------------------------
# Linear projection kernel: row-tiled GEMM, bf16 MXU operands, f32 accumulate.
# ----------------------------------------------------------------------------
def _linear_kernel(x_ref, w_ref, b_ref, o_ref):
    # x: (bn, d_in)   w: (d_in, d_out) bf16   b: (1, d_out) f32   o: (bn, d_out)
    acc = jnp.dot(x_ref[...].astype(jnp.bfloat16), w_ref[...],
                  preferred_element_type=jnp.float32)
    o_ref[...] = (acc + b_ref[...]).astype(o_ref.dtype)


def pallas_linear(x, w, b, *, out_dtype=jnp.float32, block_rows=1024):
    """y = x @ w + b, tiled over rows so DMA pipelines against the MXU."""
    n, d_in = x.shape
    d_out = w.shape[1]
    bn = n if n <= block_rows else block_rows
    grid = (pl.cdiv(n, bn),)

    tile_bytes = (_nbytes((bn, d_in), x.dtype)
                  + _nbytes((d_in, d_out), jnp.bfloat16)
                  + _nbytes((1, d_out), jnp.float32)
                  + _nbytes((bn, d_out), out_dtype))
    cost = pl.CostEstimate(
        flops=2 * n * d_in * d_out,
        transcendentals=0,
        bytes_accessed=(_nbytes((n, d_in), x.dtype)
                        + _nbytes((d_in, d_out), jnp.bfloat16)
                        + _nbytes((d_out,), jnp.float32)
                        + _nbytes((n, d_out), out_dtype)))

    return pl.pallas_call(
        _linear_kernel,
        out_shape=jax.ShapeDtypeStruct((n, d_out), out_dtype),
        grid=grid,
        in_specs=[
            pl.BlockSpec((bn, d_in), lambda i: (i, 0)),
            # Resident weight / bias (constant block index along the grid).
            # TODO(synk): pipeline_mode=pl.Buffered(1) to drop the 2nd buffer.
            pl.BlockSpec((d_in, d_out), lambda i: (0, 0)),
            pl.BlockSpec((1, d_out), lambda i: (0, 0)),
        ],
        out_specs=pl.BlockSpec((bn, d_out), lambda i: (i, 0)),
        compiler_params=pltpu.CompilerParams(
            dimension_semantics=("parallel",),
            vmem_limit_bytes=_vmem_limit(tile_bytes)),
        cost_estimate=cost,
    )(x, w.astype(jnp.bfloat16), b.astype(jnp.float32).reshape(1, d_out))


# ----------------------------------------------------------------------------
# Multi-head full attention kernel: grid (B, L-tiles), all heads per step.
# ----------------------------------------------------------------------------
def _attn_kernel(q_ref, k_ref, v_ref, o_ref, a_ref=None, *,
                 n_heads, d_keys, d_values, output_attention):
    # q_ref: (1, Lt, H*E) bf16   k_ref: (1, S, H*E) bf16   v_ref: (1, S, H*D) bf16
    # o_ref: (1, Lt, H*D)        a_ref: (1, H, Lt, S) (optional)
    head_outs = []
    for h in range(n_heads):  # static unroll (small H); see TODO for H >= 8
        q_h = q_ref[0, :, h * d_keys:(h + 1) * d_keys]        # (Lt, E) (scale in W_q)
        k_h = k_ref[0, :, h * d_keys:(h + 1) * d_keys]        # (S, E)
        v_h = v_ref[0, :, h * d_values:(h + 1) * d_values]    # (S, D)

        # Contract last dims directly (no k.T -> no XLU transpose); bf16 MXU, f32 acc.
        scores = lax.dot_general(
            q_h, k_h, dimension_numbers=(((1,), (1,)), ((), ())),
            preferred_element_type=jnp.float32)                # (Lt, S) f32

        m = jnp.max(scores, axis=-1, keepdims=True)            # f32 softmax stats
        p = jnp.exp(scores - m)
        denom = jnp.sum(p, axis=-1, keepdims=True)
        # Exact normalization when weights are returned; approx EUP recip otherwise.
        attn = p * pl.reciprocal(denom, approx=not output_attention)

        head_outs.append(jnp.dot(attn.astype(v_h.dtype), v_h,
                                 preferred_element_type=jnp.float32))  # (Lt, D) f32
        if output_attention:
            a_ref[0, h] = attn.astype(a_ref.dtype)

    # Single full-lane-width store of all heads (avoids H masked width-D stores).
    o_ref[0] = jnp.concatenate(head_outs, axis=-1).astype(o_ref.dtype)


def pallas_multihead_attention(q, k, v, *, n_heads, d_keys, d_values,
                               output_attention=False, block_l=256,
                               out_dtype=jnp.bfloat16, attn_dtype=jnp.bfloat16):
    """q: (B, L, H*E), k: (B, S, H*E), v: (B, S, H*D) ->
       out (B, L, H*D) [, attn (B, H, L, S)]"""
    B, L, HE = q.shape
    _, S, HD = v.shape

    bl = L if L <= block_l else block_l
    grid = (B, pl.cdiv(L, bl))

    kernel = functools.partial(
        _attn_kernel, n_heads=n_heads, d_keys=d_keys, d_values=d_values,
        output_attention=output_attention)

    tile_bytes = (_nbytes((1, bl, HE), q.dtype) + _nbytes((1, S, HE), k.dtype)
                  + _nbytes((1, S, HD), v.dtype) + _nbytes((1, bl, HD), out_dtype))
    bytes_accessed = (_nbytes(q.shape, q.dtype) + _nbytes(k.shape, k.dtype)
                      + _nbytes(v.shape, v.dtype) + _nbytes((B, L, HD), out_dtype))
    flops = 2 * B * n_heads * L * S * (d_keys + d_values)
    trans = B * n_heads * L * S

    out_struct = jax.ShapeDtypeStruct((B, L, HD), out_dtype)
    out_spec = pl.BlockSpec((1, bl, HD), lambda b, lq: (b, lq, 0))
    if output_attention:
        tile_bytes += _nbytes((1, n_heads, bl, S), attn_dtype)
        bytes_accessed += _nbytes((B, n_heads, L, S), attn_dtype)
        out_shape = (out_struct,
                     jax.ShapeDtypeStruct((B, n_heads, L, S), attn_dtype))
        out_specs = (out_spec,
                     pl.BlockSpec((1, n_heads, bl, S), lambda b, lq: (b, 0, lq, 0)))
    else:
        out_shape = out_struct
        out_specs = out_spec

    result = pl.pallas_call(
        kernel,
        out_shape=out_shape,
        grid=grid,
        in_specs=[
            pl.BlockSpec((1, bl, HE), lambda b, lq: (b, lq, 0)),   # Q tile
            # K/V: constant block index along lq -> fetched once per batch and
            # kept resident.  TODO(synk): pl.Buffered(1) to drop the 2nd buffer.
            pl.BlockSpec((1, S, HE), lambda b, lq: (b, 0, 0)),
            pl.BlockSpec((1, S, HD), lambda b, lq: (b, 0, 0)),
        ],
        out_specs=out_specs,
        compiler_params=pltpu.CompilerParams(
            dimension_semantics=("parallel", "parallel"),
            vmem_limit_bytes=_vmem_limit(tile_bytes)),
        cost_estimate=pl.CostEstimate(flops=flops, transcendentals=trans,
                                      bytes_accessed=bytes_accessed),
    )(q, k, v)

    if output_attention:
        return result
    return result, None


# ----------------------------------------------------------------------------
# Parameter setup (mimics nn.Linear / nn.Conv1d shapes; scale folded into W_q)
# ----------------------------------------------------------------------------
def init_params(key, d_model, n_heads, q_len, d_keys=None, d_values=None):
    d_keys = d_keys or d_model // n_heads
    d_values = d_values or d_model // n_heads
    scale = 1.0 / math.sqrt(float(d_keys))

    def linear_init(k, d_in, d_out):
        kw, kb = jax.random.split(k)
        bound = 1.0 / math.sqrt(d_in)
        w = jax.random.uniform(kw, (d_in, d_out), jnp.float32, -bound, bound)
        b = jax.random.uniform(kb, (d_out,), jnp.float32, -bound, bound)
        return w, b

    ks = jax.random.split(key, 5)
    wq, bq = linear_init(ks[0], d_model, d_keys * n_heads)
    wk, bk = linear_init(ks[1], d_model, d_keys * n_heads)
    wv, bv = linear_init(ks[2], d_model, d_values * n_heads)
    wo, bo = linear_init(ks[3], d_values * n_heads, d_model)

    # Fold 1/sqrt(E) into the query projection once.
    wq_s, bq_s = wq * scale, bq * scale

    params = dict(
        # MXU-facing weights stored bf16; biases stay f32 (added post-accumulate).
        wq=wq_s.astype(jnp.bfloat16), bq=bq_s,
        wk=wk.astype(jnp.bfloat16), bk=bk,
        wv=wv.astype(jnp.bfloat16), bv=bv,
        wo=wo.astype(jnp.bfloat16), bo=bo,
        # Fused QKV projection for self-attention (one HBM read of activations).
        w_qkv=jnp.concatenate([wq_s, wk, wv], axis=1).astype(jnp.bfloat16),
        b_qkv=jnp.concatenate([bq_s, bk, bv], axis=0),
    )
    # Conv1d(d_model, d_keys*n_heads*2, q_len) params: only used when
    # local_casual=True; kept for parameter parity, unused on the default path.
    conv_bound = 1.0 / math.sqrt(d_model * q_len)
    kcw, kcb = jax.random.split(ks[4])
    params["conv_w"] = jax.random.uniform(
        kcw, (d_keys * n_heads * 2, d_model, q_len), jnp.float32,
        -conv_bound, conv_bound)
    params["conv_b"] = jax.random.uniform(
        kcb, (d_keys * n_heads * 2,), jnp.float32, -conv_bound, conv_bound)
    return params


# ----------------------------------------------------------------------------
# Forward pass (glue in plain JAX, hot path in Pallas, no transposes)
# ----------------------------------------------------------------------------
@functools.partial(jax.jit,
                   static_argnames=("n_heads", "output_attention", "self_attention"))
def attention_layer_forward(queries, keys, values, params, n_heads,
                            output_attention=False, self_attention=False):
    B, L, d_model = queries.shape
    _, S, _ = keys.shape
    H = n_heads
    d_keys = params["wq"].shape[1] // H
    d_values = params["wv"].shape[1] // H
    HE, HD = H * d_keys, H * d_values

    if self_attention:
        # Fused QKV GEMM: one pass over the activations, triple the GEMM N.
        qkv = pallas_linear(queries.reshape(B * L, d_model),
                            params["w_qkv"], params["b_qkv"],
                            out_dtype=jnp.bfloat16)
        q = qkv[:, :HE].reshape(B, L, HE)
        k = qkv[:, HE:2 * HE].reshape(B, S, HE)
        v = qkv[:, 2 * HE:].reshape(B, S, HD)
    else:
        q = pallas_linear(queries.reshape(B * L, d_model), params["wq"],
                          params["bq"], out_dtype=jnp.bfloat16).reshape(B, L, HE)
        k = pallas_linear(keys.reshape(B * S, d_model), params["wk"],
                          params["bk"], out_dtype=jnp.bfloat16).reshape(B, S, HE)
        v = pallas_linear(values.reshape(B * S, d_model), params["wv"],
                          params["bv"], out_dtype=jnp.bfloat16).reshape(B, S, HD)

    # Multi-head attention; output comes back directly as a bf16 (B, L, H*D)
    # slab (mix=False path), feeding the output projection with no transposes.
    out, attn = pallas_multihead_attention(
        q, k, v, n_heads=H, d_keys=d_keys, d_values=d_values,
        output_attention=output_attention)

    out = pallas_linear(out.reshape(B * L, HD), params["wo"], params["bo"],
                        out_dtype=jnp.float32).reshape(B, L, d_model)
    return out, attn


# ----------------------------------------------------------------------------
# Pure-jnp f32 reference (same math; scale already folded into W_q in params)
# ----------------------------------------------------------------------------
def reference_forward(queries, keys, values, params, n_heads):
    H = n_heads
    wq = params["wq"].astype(jnp.float32)
    wk = params["wk"].astype(jnp.float32)
    wv = params["wv"].astype(jnp.float32)
    wo = params["wo"].astype(jnp.float32)
    q = queries @ wq + params["bq"]
    k = keys @ wk + params["bk"]
    v = values @ wv + params["bv"]
    B, L, _ = queries.shape
    S = keys.shape[1]
    E = wq.shape[1] // H
    D = wv.shape[1] // H
    qh = q.reshape(B, L, H, E)
    kh = k.reshape(B, S, H, E)
    vh = v.reshape(B, S, H, D)
    scores = jnp.einsum("blhe,bshe->bhls", qh, kh)
    attn = jax.nn.softmax(scores, axis=-1)
    out = jnp.einsum("bhls,bshd->blhd", attn, vh).reshape(B, L, H * D)
    out = out @ wo + params["bo"]
    return out, attn


# ----------------------------------------------------------------------------
if __name__ == "__main__":
    B, L, S = 2, 8, 16
    d_model, n_heads, q_len = 32, 4, 3

    key = jax.random.PRNGKey(0)
    kp, kq, kk, kv = jax.random.split(key, 4)
    params = init_params(kp, d_model, n_heads, q_len)

    x = jax.random.normal(kq, (B, L, d_model), jnp.float32)         # self-attn input
    keys_x = jax.random.normal(kk, (B, S, d_model), jnp.float32)    # cross-attn keys
    values_x = jax.random.normal(kv, (B, S, d_model), jnp.float32)  # cross-attn values

    # Hot path: self-attention, fused QKV GEMM, no attention-weights writeback.
    out_sa, attn_sa = attention_layer_forward(
        x, x, x, params, n_heads, output_attention=False, self_attention=True)
    out_sa = jax.block_until_ready(out_sa)
    assert out_sa.shape == (B, L, d_model) and attn_sa is None
    ref_sa, _ = reference_forward(x, x, x, params, n_heads)
    assert float(jnp.max(jnp.abs(out_sa - ref_sa))) < 1e-1, "self-attention mismatch"

    # Cross-attention with attention-weights output (bf16 weights slab).
    out_ca, attn_ca = attention_layer_forward(
        x, keys_x, values_x, params, n_heads,
        output_attention=True, self_attention=False)
    out_ca = jax.block_until_ready(out_ca)
    attn_ca = jax.block_until_ready(attn_ca)
    assert out_ca.shape == (B, L, d_model)
    assert attn_ca.shape == (B, n_heads, L, S)
    ref_ca, ref_attn = reference_forward(x, keys_x, values_x, params, n_heads)
    assert float(jnp.max(jnp.abs(out_ca - ref_ca))) < 1e-1, "cross-attention mismatch"
    assert float(jnp.max(jnp.abs(attn_ca.astype(jnp.float32) - ref_attn))) < 5e-2, \
        "attention-weights mismatch"

    print("KERNEL_OK")
</pallas_src>

<mosaic_0001>
module attributes {stable_mosaic.version = 11 : i64} {
  func.func @_linear_kernel(%arg0: i32, %arg1: memref<16x32xbf16, #tpu.memory_space<vmem>>, %arg2: memref<32x32xbf16, #tpu.memory_space<vmem>>, %arg3: memref<1x32xf32, #tpu.memory_space<vmem>>, %arg4: memref<16x32xf32, #tpu.memory_space<vmem>>) attributes {dimension_semantics = [#tpu.dimension_semantics<parallel>], iteration_bounds = array<i64: 1>, scalar_prefetch = 0 : i64, scratch_operands = 0 : i64, tpu.core_type = #tpu.core_type<tc>, window_params = [{transform_indices = @transform_0, window_bounds = array<i64: 16, 32>}, {pipeline_mode = #tpu.pipeline_mode<synchronous>, transform_indices = @transform_1, window_bounds = array<i64: 32, 32>}, {pipeline_mode = #tpu.pipeline_mode<synchronous>, transform_indices = @transform_2, window_bounds = array<i64: 1, 32>}, {transform_indices = @transform_3, window_bounds = array<i64: 16, 32>}]} {
    %c0 = arith.constant 0 : index
    %c0_0 = arith.constant 0 : index
    %0 = vector.load %arg1[%c0, %c0_0] : memref<16x32xbf16, #tpu.memory_space<vmem>>, vector<16x32xbf16>
    %c0_1 = arith.constant 0 : index
    %c0_2 = arith.constant 0 : index
    %1 = vector.load %arg2[%c0_1, %c0_2] : memref<32x32xbf16, #tpu.memory_space<vmem>>, vector<32x32xbf16>
    %cst = arith.constant dense<0.000000e+00> : vector<16x32xf32>
    %2 = tpu.matmul %0, %1, %cst {dimension_numbers = #tpu.dot_dimension_numbers<[1], [0], [0], [1], [0, 0, 1, 1], [], []>} : vector<16x32xbf16>, vector<32x32xbf16>, vector<16x32xf32> -> vector<16x32xf32>
    %c0_3 = arith.constant 0 : index
    %c0_4 = arith.constant 0 : index
    %3 = vector.load %arg3[%c0_3, %c0_4] : memref<1x32xf32, #tpu.memory_space<vmem>>, vector<1x32xf32>
    %4 = vector.broadcast %3 : vector<1x32xf32> to vector<16x32xf32>
    %5 = arith.addf %2, %4 : vector<16x32xf32>
    %c0_5 = arith.constant 0 : index
    %c0_6 = arith.constant 0 : index
    %6 = vector.load %arg4[%c0_5, %c0_6] : memref<16x32xf32, #tpu.memory_space<vmem>>, vector<16x32xf32>
    tpu.vector_store %arg4[%c0_5, %c0_6], %5 {strides = array<i32>} : memref<16x32xf32, #tpu.memory_space<vmem>>, vector<16x32xf32>,
    return
  }
  func.func @transform_0(%arg0: i32) -> (i32, i32) {
    %c0_i32 = arith.constant 0 : i32
    %c0_i32_0 = arith.constant 0 : i32
    return %arg0, %c0_i32 : i32, i32
  }
  func.func @transform_1(%arg0: i32) -> (i32, i32) {
    %c0_i32 = arith.constant 0 : i32
    %c0_i32_0 = arith.constant 0 : i32
    %c0_i32_1 = arith.constant 0 : i32
    return %c0_i32, %c0_i32_0 : i32, i32
  }
  func.func @transform_2(%arg0: i32) -> (i32, i32) {
    %c0_i32 = arith.constant 0 : i32
    %c0_i32_0 = arith.constant 0 : i32
    %c0_i32_1 = arith.constant 0 : i32
    return %c0_i32, %c0_i32_0 : i32, i32
  }
  func.func @transform_3(%arg0: i32) -> (i32, i32) {
    %c0_i32 = arith.constant 0 : i32
    %c0_i32_0 = arith.constant 0 : i32
    return %arg0, %c0_i32 : i32, i32
  }
}

module attributes {stable_mosaic.version = 11 : i64} {
  func.func @_attn_kernel(%arg0: i32, %arg1: i32, %arg2: memref<1x8x32xbf16, #tpu.memory_space<vmem>>, %arg3: memref<1x8x32xbf16, #tpu.memory_space<vmem>>, %arg4: memref<1x8x32xbf16, #tpu.memory_space<vmem>>, %arg5: memref<1x8x32xbf16, #tpu.memory_space<vmem>>) attributes {dimension_semantics = [#tpu.dimension_semantics<parallel>, #tpu.dimension_semantics<parallel>], iteration_bounds = array<i64: 2, 1>, scalar_prefetch = 0 : i64, scratch_operands = 0 : i64, tpu.core_type = #tpu.core_type<tc>, window_params = [{transform_indices = @transform_0, window_bounds = array<i64: 1, 8, 32>}, {transform_indices = @transform_1, window_bounds = array<i64: 1, 8, 32>}, {transform_indices = @transform_2, window_bounds = array<i64: 1, 8, 32>}, {transform_indices = @transform_3, window_bounds = array<i64: 1, 8, 32>}]} {
    %c0 = arith.constant 0 : index
    %c0_0 = arith.constant 0 : index
    %c0_1 = arith.constant 0 : index
    %0 = vector.load %arg2[%c0, %c0_0, %c0_1] : memref<1x8x32xbf16, #tpu.memory_space<vmem>>, vector<1x8x8xbf16>
    %1 = vector.shape_cast %0 : vector<1x8x8xbf16> to vector<8x8xbf16>
    %c0_2 = arith.constant 0 : index
    %c0_3 = arith.constant 0 : index
    %c0_4 = arith.constant 0 : index
    %2 = vector.load %arg3[%c0_2, %c0_3, %c0_4] : memref<1x8x32xbf16, #tpu.memory_space<vmem>>, vector<1x8x8xbf16>
    %3 = vector.shape_cast %2 : vector<1x8x8xbf16> to vector<8x8xbf16>
    %c0_5 = arith.constant 0 : index
    %c0_6 = arith.constant 0 : index
    %c0_7 = arith.constant 0 : index
    %4 = vector.load %arg4[%c0_5, %c0_6, %c0_7] : memref<1x8x32xbf16, #tpu.memory_space<vmem>>, vector<1x8x8xbf16>
    %5 = vector.shape_cast %4 : vector<1x8x8xbf16> to vector<8x8xbf16>
    %cst = arith.constant dense<0.000000e+00> : vector<8x8xf32>
    %6 = tpu.matmul %1, %3, %cst {dimension_numbers = #tpu.dot_dimension_numbers<[1], [1], [0], [0], [0, 0, 1, 0], [], []>} : vector<8x8xbf16>, vector<8x8xbf16>, vector<8x8xf32> -> vector<8x8xf32>
    %cst_8 = arith.constant dense<0xFF800000> : vector<8xf32>
    %7 = vector.multi_reduction <maximumf>, %6, %cst_8 [1] : vector<8x8xf32> to vector<8xf32>
    %8 = vector.shape_cast %7 : vector<8xf32> to vector<8x1xf32>
    %9 = vector.broadcast %8 : vector<8x1xf32> to vector<8x8xf32>
    %10 = arith.subf %6, %9 : vector<8x8xf32>
    %11 = math.exp %10 : vector<8x8xf32>
    %cst_9 = arith.constant dense<0.000000e+00> : vector<8xf32>
    %12 = vector.multi_reduction <add>, %11, %cst_9 [1] : vector<8x8xf32> to vector<8xf32>
    %13 = vector.shape_cast %12 : vector<8xf32> to vector<8x1xf32>
    %14 = tpu.reciprocal %13 {approx = true} : vector<8x1xf32> -> vector<8x1xf32>
    %15 = vector.broadcast %14 : vector<8x1xf32> to vector<8x8xf32>
    %16 = arith.mulf %11, %15 : vector<8x8xf32>
    %17 = arith.truncf %16 : vector<8x8xf32> to vector<8x8xbf16>
    %cst_10 = arith.constant dense<0.000000e+00> : vector<8x8xf32>
    %18 = tpu.matmul %17, %5, %cst_10 {dimension_numbers = #tpu.dot_dimension_numbers<[1], [0], [0], [1], [0, 0, 1, 1], [], []>} : vector<8x8xbf16>, vector<8x8xbf16>, vector<8x8xf32> -> vector<8x8xf32>
    %c0_11 = arith.constant 0 : index
    %c0_12 = arith.constant 0 : index
    %c8 = arith.constant 8 : index
    %19 = vector.load %arg2[%c0_11, %c0_12, %c8] : memref<1x8x32xbf16, #tpu.memory_space<vmem>>, vector<1x8x8xbf16>
    %20 = vector.shape_cast %19 : vector<1x8x8xbf16> to vector<8x8xbf16>
    %c0_13 = arith.constant 0 : index
    %c0_14 = arith.constant 0 : index
    %c8_15 = arith.constant 8 : index
    %21 = vector.load %arg3[%c0_13, %c0_14, %c8_15] : memref<1x8x32xbf16, #tpu.memory_space<vmem>>, vector<1x8x8xbf16>
    %22 = vector.shape_cast %21 : vector<1x8x8xbf16> to vector<8x8xbf16>
    %c0_16 = arith.constant 0 : index
    %c0_17 = arith.constant 0 : index
    %c8_18 = arith.constant 8 : index
    %23 = vector.load %arg4[%c0_16, %c0_17, %c8_18] : memref<1x8x32xbf16, #tpu.memory_space<vmem>>, vector<1x8x8xbf16>
    %24 = vector.shape_cast %23 : vector<1x8x8xbf16> to vector<8x8xbf16>
    %cst_19 = arith.constant dense<0.000000e+00> : vector<8x8xf32>
    %25 = tpu.matmul %20, %22, %cst_19 {dimension_numbers = #tpu.dot_dimension_numbers<[1], [1], [0], [0], [0, 0, 1, 0], [], []>} : vector<8x8xbf16>, vector<8x8xbf16>, vector<8x8xf32> -> vector<8x8xf32>
    %cst_20 = arith.constant dense<0xFF800000> : vector<8xf32>
    %26 = vector.multi_reduction <maximumf>, %25, %cst_20 [1] : vector<8x8xf32> to vector<8xf32>
    %27 = vector.shape_cast %26 : vector<8xf32> to vector<8x1xf32>
    %28 = vector.broadcast %27 : vector<8x1xf32> to vector<8x8xf32>
    %29 = arith.subf %25, %28 : vector<8x8xf32>
    %30 = math.exp %29 : vector<8x8xf32>
    %cst_21 = arith.constant dense<0.000000e+00> : vector<8xf32>
    %31 = vector.multi_reduction <add>, %30, %cst_21 [1] : vector<8x8xf32> to vector<8xf32>
    %32 = vector.shape_cast %31 : vector<8xf32> to vector<8x1xf32>
    %33 = tpu.reciprocal %32 {approx = true} : vector<8x1xf32> -> vector<8x1xf32>
    %34 = vector.broadcast %33 : vector<8x1xf32> to vector<8x8xf32>
    %35 = arith.mulf %30, %34 : vector<8x8xf32>
    %36 = arith.truncf %35 : vector<8x8xf32> to vector<8x8xbf16>
    %cst_22 = arith.constant dense<0.000000e+00> : vector<8x8xf32>
    %37 = tpu.matmul %36, %24, %cst_22 {dimension_numbers = #tpu.dot_dimension_numbers<[1], [0], [0], [1], [0, 0, 1, 1], [], []>} : vector<8x8xbf16>, vector<8x8xbf16>, vector<8x8xf32> -> vector<8x8xf32>
    %c0_23 = arith.constant 0 : index
    %c0_24 = arith.constant 0 : index
    %c16 = arith.constant 16 : index
    %38 = vector.load %arg2[%c0_23, %c0_24, %c16] : memref<1x8x32xbf16, #tpu.memory_space<vmem>>, vector<1x8x8xbf16>
    %39 = vector.shape_cast %38 : vector<1x8x8xbf16> to vector<8x8xbf16>
    %c0_25 = arith.constant 0 : index
    %c0_26 = arith.constant 0 : index
    %c16_27 = arith.constant 16 : index
    %40 = vector.load %arg3[%c0_25, %c0_26, %c16_27] : memref<1x8x32xbf16, #tpu.memory_space<vmem>>, vector<1x8x8xbf16>
    %41 = vector.shape_cast %40 : vector<1x8x8xbf16> to vector<8x8xbf16>
    %c0_28 = arith.constant 0 : index
    %c0_29 = arith.constant 0 : index
    %c16_30 = arith.constant 16 : index
    %42 = vector.load %arg4[%c0_28, %c0_29, %c16_30] : memref<1x8x32xbf16, #tpu.memory_space<vmem>>, vector<1x8x8xbf16>
    %43 = vector.shape_cast %42 : vector<1x8x8xbf16> to vector<8x8xbf16>
    %cst_31 = arith.constant dense<0.000000e+00> : vector<8x8xf32>
    %44 = tpu.matmul %39, %41, %cst_31 {dimension_numbers = #tpu.dot_dimension_numbers<[1], [1], [0], [0], [0, 0, 1, 0], [], []>} : vector<8x8xbf16>, vector<8x8xbf16>, vector<8x8xf32> -> vector<8x8xf32>
    %cst_32 = arith.constant dense<0xFF800000> : vector<8xf32>
    %45 = vector.multi_reduction <maximumf>, %44, %cst_32 [1] : vector<8x8xf32> to vector<8xf32>
    %46 = vector.shape_cast %45 : vector<8xf32> to vector<8x1xf32>
    %47 = vector.broadcast %46 : vector<8x1xf32> to vector<8x8xf32>
    %48 = arith.subf %44, %47 : vector<8x8xf32>
    %49 = math.exp %48 : vector<8x8xf32>
    %cst_33 = arith.constant dense<0.000000e+00> : vector<8xf32>
    %50 = vector.multi_reduction <add>, %49, %cst_33 [1] : vector<8x8xf32> to vector<8xf32>
    %51 = vector.shape_cast %50 : vector<8xf32> to vector<8x1xf32>
    %52 = tpu.reciprocal %51 {approx = true} : vector<8x1xf32> -> vector<8x1xf32>
    %53 = vector.broadcast %52 : vector<8x1xf32> to vector<8x8xf32>
    %54 = arith.mulf %49, %53 : vector<8x8xf32>
    %55 = arith.truncf %54 : vector<8x8xf32> to vector<8x8xbf16>
    %cst_34 = arith.constant dense<0.000000e+00> : vector<8x8xf32>
    %56 = tpu.matmul %55, %43, %cst_34 {dimension_numbers = #tpu.dot_dimension_numbers<[1], [0], [0], [1], [0, 0, 1, 1], [], []>} : vector<8x8xbf16>, vector<8x8xbf16>, vector<8x8xf32> -> vector<8x8xf32>
    %c0_35 = arith.constant 0 : index
    %c0_36 = arith.constant 0 : index
    %c24 = arith.constant 24 : index
    %57 = vector.load %arg2[%c0_35, %c0_36, %c24] : memref<1x8x32xbf16, #tpu.memory_space<vmem>>, vector<1x8x8xbf16>
    %58 = vector.shape_cast %57 : vector<1x8x8xbf16> to vector<8x8xbf16>
    %c0_37 = arith.constant 0 : index
    %c0_38 = arith.constant 0 : index
    %c24_39 = arith.constant 24 : index
    %59 = vector.load %arg3[%c0_37, %c0_38, %c24_39] : memref<1x8x32xbf16, #tpu.memory_space<vmem>>, vector<1x8x8xbf16>
    %60 = vector.shape_cast %59 : vector<1x8x8xbf16> to vector<8x8xbf16>
    %c0_40 = arith.constant 0 : index
    %c0_41 = arith.constant 0 : index
    %c24_42 = arith.constant 24 : index
    %61 = vector.load %arg4[%c0_40, %c0_41, %c24_42] : memref<1x8x32xbf16, #tpu.memory_space<vmem>>, vector<1x8x8xbf16>
    %62 = vector.shape_cast %61 : vector<1x8x8xbf16> to vector<8x8xbf16>
    %cst_43 = arith.constant dense<0.000000e+00> : vector<8x8xf32>
    %63 = tpu.matmul %58, %60, %cst_43 {dimension_numbers = #tpu.dot_dimension_numbers<[1], [1], [0], [0], [0, 0, 1, 0], [], []>} : vector<8x8xbf16>, vector<8x8xbf16>, vector<8x8xf32> -> vector<8x8xf32>
    %cst_44 = arith.constant dense<0xFF800000> : vector<8xf32>
    %64 = vector.multi_reduction <maximumf>, %63, %cst_44 [1] : vector<8x8xf32> to vector<8xf32>
    %65 = vector.shape_cast %64 : vector<8xf32> to vector<8x1xf32>
    %66 = vector.broadcast %65 : vector<8x1xf32> to vector<8x8xf32>
    %67 = arith.subf %63, %66 : vector<8x8xf32>
    %68 = math.exp %67 : vector<8x8xf32>
    %cst_45 = arith.constant dense<0.000000e+00> : vector<8xf32>
    %69 = vector.multi_reduction <add>, %68, %cst_45 [1] : vector<8x8xf32> to vector<8xf32>
    %70 = vector.shape_cast %69 : vector<8xf32> to vector<8x1xf32>
    %71 = tpu.reciprocal %70 {approx = true} : vector<8x1xf32> -> vector<8x1xf32>
    %72 = vector.broadcast %71 : vector<8x1xf32> to vector<8x8xf32>
    %73 = arith.mulf %68, %72 : vector<8x8xf32>
    %74 = arith.truncf %73 : vector<8x8xf32> to vector<8x8xbf16>
    %cst_46 = arith.constant dense<0.000000e+00> : vector<8x8xf32>
    %75 = tpu.matmul %74, %62, %cst_46 {dimension_numbers = #tpu.dot_dimension_numbers<[1], [0], [0], [1], [0, 0, 1, 1], [], []>} : vector<8x8xbf16>, vector<8x8xbf16>, vector<8x8xf32> -> vector<8x8xf32>
    %76 = tpu.concatenate %18, %37, %56, %75 in 1 : vector<8x8xf32>, vector<8x8xf32>, vector<8x8xf32>, vector<8x8xf32> -> vector<8x32xf32>
    %77 = arith.truncf %76 : vector<8x32xf32> to vector<8x32xbf16>
    %c0_47 = arith.constant 0 : index
    %c0_48 = arith.constant 0 : index
    %c0_49 = arith.constant 0 : index
    %78 = vector.load %arg5[%c0_47, %c0_48, %c0_49] : memref<1x8x32xbf16, #tpu.memory_space<vmem>>, vector<1x8x32xbf16>
    %79 = vector.shape_cast %78 : vector<1x8x32xbf16> to vector<8x32xbf16>
    %80 = vector.shape_cast %77 : vector<8x32xbf16> to vector<1x8x32xbf16>
    tpu.vector_store %arg5[%c0_47, %c0_48, %c0_49], %80 {strides = array<i32>} : memref<1x8x32xbf16, #tpu.memory_space<vmem>>, vector<1x8x32xbf16>,
    return
  }
  func.func @transform_0(%arg0: i32, %arg1: i32) -> (i32, i32, i32) {
    %c0_i32 = arith.constant 0 : i32
    %c0_i32_0 = arith.constant 0 : i32
    return %arg0, %arg1, %c0_i32 : i32, i32, i32
  }
  func.func @transform_1(%arg0: i32, %arg1: i32) -> (i32, i32, i32) {
    %c0_i32 = arith.constant 0 : i32
    %c0_i32_0 = arith.constant 0 : i32
    %c0_i32_1 = arith.constant 0 : i32
    return %arg0, %c0_i32, %c0_i32_0 : i32, i32, i32
  }
  func.func @transform_2(%arg0: i32, %arg1: i32) -> (i32, i32, i32) {
    %c0_i32 = arith.constant 0 : i32
    %c0_i32_0 = arith.constant 0 : i32
    %c0_i32_1 = arith.constant 0 : i32
    return %arg0, %c0_i32, %c0_i32_0 : i32, i32, i32
  }
  func.func @transform_3(%arg0: i32, %arg1: i32) -> (i32, i32, i32) {
    %c0_i32 = arith.constant 0 : i32
    %c0_i32_0 = arith.constant 0 : i32
    return %arg0, %arg1, %c0_i32 : i32, i32, i32
  }
}

module attributes {stable_mosaic.version = 11 : i64} {
  func.func @_linear_kernel(%arg0: i32, %arg1: memref<16x32xf32, #tpu.memory_space<vmem>>, %arg2: memref<32x96xbf16, #tpu.memory_space<vmem>>, %arg3: memref<1x96xf32, #tpu.memory_space<vmem>>, %arg4: memref<16x96xbf16, #tpu.memory_space<vmem>>) attributes {dimension_semantics = [#tpu.dimension_semantics<parallel>], iteration_bounds = array<i64: 1>, scalar_prefetch = 0 : i64, scratch_operands = 0 : i64, tpu.core_type = #tpu.core_type<tc>, window_params = [{transform_indices = @transform_0, window_bounds = array<i64: 16, 32>}, {pipeline_mode = #tpu.pipeline_mode<synchronous>, transform_indices = @transform_1, window_bounds = array<i64: 32, 96>}, {pipeline_mode = #tpu.pipeline_mode<synchronous>, transform_indices = @transform_2, window_bounds = array<i64: 1, 96>}, {transform_indices = @transform_3, window_bounds = array<i64: 16, 96>}]} {
    %c0 = arith.constant 0 : index
    %c0_0 = arith.constant 0 : index
    %0 = vector.load %arg1[%c0, %c0_0] : memref<16x32xf32, #tpu.memory_space<vmem>>, vector<16x32xf32>
    %1 = arith.truncf %0 : vector<16x32xf32> to vector<16x32xbf16>
    %c0_1 = arith.constant 0 : index
    %c0_2 = arith.constant 0 : index
    %2 = vector.load %arg2[%c0_1, %c0_2] : memref<32x96xbf16, #tpu.memory_space<vmem>>, vector<32x96xbf16>
    %cst = arith.constant dense<0.000000e+00> : vector<16x96xf32>
    %3 = tpu.matmul %1, %2, %cst {dimension_numbers = #tpu.dot_dimension_numbers<[1], [0], [0], [1], [0, 0, 1, 1], [], []>} : vector<16x32xbf16>, vector<32x96xbf16>, vector<16x96xf32> -> vector<16x96xf32>
    %c0_3 = arith.constant 0 : index
    %c0_4 = arith.constant 0 : index
    %4 = vector.load %arg3[%c0_3, %c0_4] : memref<1x96xf32, #tpu.memory_space<vmem>>, vector<1x96xf32>
    %5 = vector.broadcast %4 : vector<1x96xf32> to vector<16x96xf32>
    %6 = arith.addf %3, %5 : vector<16x96xf32>
    %7 = arith.truncf %6 : vector<16x96xf32> to vector<16x96xbf16>
    %c0_5 = arith.constant 0 : index
    %c0_6 = arith.constant 0 : index
    %8 = vector.load %arg4[%c0_5, %c0_6] : memref<16x96xbf16, #tpu.memory_space<vmem>>, vector<16x96xbf16>
    tpu.vector_store %arg4[%c0_5, %c0_6], %7 {strides = array<i32>} : memref<16x96xbf16, #tpu.memory_space<vmem>>, vector<16x96xbf16>,
    return
  }
  func.func @transform_0(%arg0: i32) -> (i32, i32) {
    %c0_i32 = arith.constant 0 : i32
    %c0_i32_0 = arith.constant 0 : i32
    return %arg0, %c0_i32 : i32, i32
  }
  func.func @transform_1(%arg0: i32) -> (i32, i32) {
    %c0_i32 = arith.constant 0 : i32
    %c0_i32_0 = arith.constant 0 : i32
    %c0_i32_1 = arith.constant 0 : i32
    return %c0_i32, %c0_i32_0 : i32, i32
  }
  func.func @transform_2(%arg0: i32) -> (i32, i32) {
    %c0_i32 = arith.constant 0 : i32
    %c0_i32_0 = arith.constant 0 : i32
    %c0_i32_1 = arith.constant 0 : i32
    return %c0_i32, %c0_i32_0 : i32, i32
  }
  func.func @transform_3(%arg0: i32) -> (i32, i32) {
    %c0_i32 = arith.constant 0 : i32
    %c0_i32_0 = arith.constant 0 : i32
    return %arg0, %c0_i32 : i32, i32
  }
}

</mosaic_0001>

<bundles_post_ra>
// kernel: attention_layer_forward.5
= control target key start
LH: loop header
LB: loop body
LE: loop exit
PB: predicated region body
PF: predicated region fallthrough
CT: control target
= control target key end

     0   :  { %s165_s0 = inlined_call_operand.vmem [shape: bf16[16,32], index: 0, kind: input, shape index: {}]   ;;  %s166_s1 = inlined_call_operand.vmem [shape: bf16[32,32], index: 1, kind: input, shape index: {}]   ;;  %s167_s2 = inlined_call_operand.vmem [shape: f32[1,32], index: 2, kind: input, shape index: {}]   ;;  %s168_s3 = inlined_call_operand.hbm [shape: f32[16,32], index: 3, kind: output, shape index: {}]  }
   0x1   :  { %v96_v0 = vld [vmem:[%s166_s1 + $0x8] sm:$0xff] }
   0x2   :  { %8 = vsyncpa [#allocation3], 0  ;;  %53 = vmatpush.bf16.msra.mxu0 %v96_v0  ;;  %v95_v1 = vld [vmem:[%s166_s1] sm:$0xff]  ;;  %vm43_vm0 = vcmask 261120   ;;  %s127_s20 = smov [#allocation2]   ;;  %s69_s1 = sshll.u32 %s168_s3, 4  ;;  %s70_s1 = int_to_ptr.hbm [resolvable:$true] %s69_s1 }
   0x3   :  { %v94_v2 = vld [vmem:[%s165_s0] sm:$0xff]  ;;  %s67_s21 = sshll.u32 %s127_s20, 4  ;;  %s128_s0 = smov 128   ;;  %s68_s21 = int_to_ptr.vmem [resolvable:$true] %s67_s21 }
   0x4   :  { %v100_v3 = vld [vmem:[%s167_s2] ss:$0 sm:$0xff]  ;;  %s129_s24 = smov 8  }
   0x6   :  { %54 = vmatpush.bf16.msra.mxu0 %v95_v1 }
   0x9   :  { %93 = vmatmul.msk.bf16.vlgmr.msra.gmra.mxu0 %vm43_vm0, %v94_v2 }
  0x86   :  { %v56_v4 = vpop.f32.mrf.mxu0 }
  0x87   :  { %v57_v5 = vadd.f32 %v100_v3, %v56_v4 }
  0x89   :  { %61 = vst.msk [vmem:[#allocation2] sm:$0xff] %vm43_vm0, %v57_v5 }
  0x8e   :  { %v58_v6 = vpop.f32.mrf.mxu0 }
  0x8f   :  { %v59_v7 = vadd.f32 %v100_v3, %v58_v6 }
  0x91   :  { %62 = vst.msk [vmem:[#allocation2 + $0x8] sm:$0xff] %vm43_vm0, %v59_v7 }
  0x92   :  { %75 = dma.vmem_to_hbm [thread:$0]  %s68_s21, 256, %s70_s1, [#allocation3], %s128_s0, %s128_s0, %s129_s24  }
  0x93   :  { %125 = dma.done.wait [#allocation3], 256  }
  0x94   :  { %126 = vsyncadd [#allocation3], 4294967040 }
  0x95   :  { %80 = vsyncpa [#allocation3], 1 }

// kernel: attention_layer_forward.3
= control target key start
LH: loop header
LB: loop body
LE: loop exit
PB: predicated region body
PF: predicated region fallthrough
CT: control target
= control target key end

     0   :  { %8 = vsyncpa [#allocation3], 0  ;;  %s210_s0 = inlined_call_operand.hbm [shape: f32[16,32], index: 0, kind: input, shape index: {}]   ;;  %s211_s1 = inlined_call_operand.hbm [shape: bf16[32,96], index: 1, kind: input, shape index: {}]   ;;  %s212_s2 = inlined_call_operand.vmem [shape: f32[1,96], index: 2, kind: input, shape index: {}]   ;;  %s213_s3 = inlined_call_operand.vmem [shape: bf16[16,96], index: 3, kind: output, shape index: {}]  }
   0x1   :  { %s14_s14 = sshll.u32 %s210_s0, 4  ;;  %s15_s14 = int_to_ptr.hbm [resolvable:$true] %s14_s14 }
   0x2   :  { %9 = vsyncpa [#allocation5], 0  ;;  %s169_s15 = smov [#allocation2]   ;;  %s27_s19 = sshll.u32 %s211_s1, 4  ;;  %s28_s19 = int_to_ptr.hbm [resolvable:$true] %s27_s19 }
   0x3   :  { %s16_s16 = sshll.u32 %s169_s15, 4  ;;  %s170_s20 = smov 128   ;;  %s17_s16 = int_to_ptr.vmem [resolvable:$true] %s16_s16 }
   0x4   :  { %s171_s21 = smov 8   ;;  %s172_s22 = smov [#allocation4]  }
   0x5   :  { %22 = dma.hbm_to_vmem [thread:$0]  %s15_s14, 256, %s17_s16, [#allocation3], %s170_s20, %s170_s20, %s171_s21  }
   0x6   :  { %s29_s23 = sshll.u32 %s172_s22, 4  ;;  %s173_s24 = smov 64   ;;  %s30_s23 = int_to_ptr.vmem [resolvable:$true] %s29_s23 }
   0x7   :  { %s174_s25 = smov 4  }
   0x8   :  { %35 = dma.hbm_to_vmem [thread:$0]  %s28_s19, 256, %s30_s23, [#allocation5], %s173_s24, %s173_s24, %s174_s25  }
   0x9   :  { %165 = dma.done.wait [#allocation3], 256  }
   0xa   :  { %166 = vsyncadd [#allocation3], 4294967040 }
   0xb   :  { %167 = dma.done.wait [#allocation5], 256  }
   0xc   :  { %168 = vsyncadd [#allocation5], 4294967040  ;;  %v109_v0 = vld [vmem:[#allocation4 + $0x8] sm:$0xff]  ;;  %v108_v1 = vld [vmem:[#allocation4] sm:$0xff]  ;;  %vm70_vm0 = vcmask 261120   ;;  %vm90_vm1 = vcmask 781312  }
   0xd   :  { %80 = vmatpush.bf16.msra.mxu0 %v109_v0  ;;  %v47_v2 = vld [vmem:[#allocation2] sm:$0xff]  ;;  %v48_v3 = vld [vmem:[#allocation2 + $0x8] sm:$0xff] }
   0xe   :  { %v49_v4 = vpack.c.bf16 %v48_v3, %v47_v2  ;;  %v116_v5 = vld [vmem:[%s212_s2] ss:$0 sm:$0xff] }
  0x11   :  { %81 = vmatpush.bf16.msra.mxu0 %v108_v1 }
  0x14   :  { %107 = vmatmul.msk.bf16.vlgmr.msra.gmra.mxu0 %vm70_vm0, %v49_v4 }
  0x91   :  { %v83_v6 = vpop.f32.mrf.mxu0 }
  0x92   :  { %v84_v7 = vadd.f32 %v116_v5, %v83_v6 }
  0x94   :  { %v88_v8 = vpack.c.bf16 %v84_v7, %v84_v7 }
  0x96   :  { %91 = vst.msk [vmem:[%s213_s3] sm:$0xf] %vm90_vm1, %v88_v8 }
  0x99   :  { %v85_v9 = vpop.f32.mrf.mxu0 }
  0x9a   :  { %v86_v10 = vadd.f32 %v116_v5, %v85_v9 }
  0x9c   :  { %v89_v11 = vpack.c.bf16 %v86_v10, %v86_v10 }
  0x9e   :  { %92 = vst.msk [vmem:[%s213_s3 + $0x4] sm:$0xf] %vm90_vm1, %v89_v11 }
  0x9f   :  { %97 = vsyncpa [#allocation3], 1 }
  0xa0   :  { %98 = vsyncpa [#allocation5], 1 }

// kernel: attention_layer_forward.4
= control target key start
LH: loop header
LB: loop body
LE: loop exit
PB: predicated region body
PF: predicated region fallthrough
CT: control target
= control target key end

     0   :  { %s697_s12 = smov 0   ;;  %s699_s13 = smov 0   ;;  %s779_s0 = inlined_call_operand.vmem [shape: bf16[2,8,32], index: 0, kind: input, shape index: {}]   ;;  %s780_s1 = inlined_call_operand.vmem [shape: bf16[2,8,32], index: 1, kind: input, shape index: {}]   ;;  %s781_s2 = inlined_call_operand.vmem [shape: bf16[2,8,32], index: 2, kind: input, shape index: {}]   ;;  %s782_s3 = inlined_call_operand.vmem [shape: bf16[2,8,32], index: 3, kind: output, shape index: {}]  }
   0x1   :  { %s701_s14 = smov 0  }
   0x2 LB: > { %s25_s15 = sadd.s32 1, %s665_s13  ;;  %p586_p0 = scmp.ge.s32.totalorder %s669_s14, 1  ;;  %s669_s14 = sphi %s701_s14, %s13_s14   ;;  %s665_s13 = sphi %s699_s13, %s784_s13   ;;  %s661_s12 = sphi %s697_s12, %s783_s12  }
   0x3   : > { %p27_p1 = scmp.ge.s32.totalorder %s25_s15, 2  ;;  %p173_p2 = scmp.lt.s32.totalorder %s669_s14, 3 }
   0x5   : > { %s786_s15 = smov (%p27_p1, %s25_s15), 0  ;;  %p174_p3 = pnand %p586_p0, %p173_p2 }
   0x6   : > { %p209_p4 = scmp.lt.s32.totalorder (!%p174_p3), %s661_s12, 1  ;;  %s671_s23 = smov (!%p174_p3), 112  }
   0x7   : > { %177 = sbr.rel (%p174_p3) target bundleno = 1078 (0x436), region = 32  ;;  %s672_s24 = smov (!%p174_p3), 104  }
   0x8   : > { %s673_s25 = smov (!%p174_p3), 120   ;;  %s674_s29 = smov (!%p174_p3), 8  }
   0x9   : > { %s675_s30 = smov (!%p174_p3), 16   ;;  %s676_s4 = smov (!%p174_p3), 24  }
   0xc   : > { %s788_s12 = smov (!%p209_p4, %s661_s12), 1  ;;  %vm235_vm0 = vcmask 64512   ;;  %vm270_vm1 = vcmask 1043456   ;;  %vm477_vm2 = vcmask 130048   ;;  %vm479_vm3 = vcmask 195584  }
   0xd   : > { %s715_s16 = sshll.u32 %s788_s12, 2  ;;  %vm482_vm4 = vcmask 257024  }
   0xe   : > { %s219_s19 = scalar_lea.vmem %s780_s1, %s715_s16  ;;  %s215_s22 = scalar_lea.vmem %s779_s0, %s715_s16 }
   0xf   : > { %v233_v0 = vld [vmem:[%s219_s19] sm:$0xf]  ;;  %s223_s28 = scalar_lea.vmem %s781_s2, %s715_s16  ;;  %s230_s7 = scalar_lea.vmem %s782_s3, %s715_s16 }
  0x10   : > { %v240_v1 = vsel %vm235_vm0, %v233_v0, 0  ;;  %v232_v2 = vld [vmem:[%s215_s22] sm:$0xf]  ;;  %v293_v3 = vunpack.c.l.b16 %v233_v0 }
  0x11   : > { %249 = vmatpush.bf16.xpose.msra.mxu0 %v240_v1  ;;  %v288_v5 = vunpack.c.l.b16 %v232_v2  ;;  %v234_v20 = vld [vmem:[%s223_s28] sm:$0xf] }
  0x12   : > { %v294_v4 = vpack.c.b16 %v293_v3, %v293_v3  ;;  %v272_v21 = vsel %vm270_vm1, %v234_v20, 0  ;;  %v329_v41 = vunpack.c.l.b16 %v234_v20 }
  0x13   : > { %v289_v6 = vpack.c.b16 %v288_v5, %v288_v5  ;;  %281 = vmatpush.bf16.msra.mxu1 %v272_v21 }
  0x14   : > { %354 = vrot.lane.b32.xlu2 %v294_v4, %s671_s23  ;;  %v330_v42 = vpack.c.b16 %v329_v41, %v329_v41 }
  0x18   : > { %591 = vmatmul.msk.bf16.vlgmr.msra.gmra.mxu0 %vm235_vm0, %v232_v2 }
  0x1c   : > { %410 = vrot.lane.b32.xlu2 %v294_v4, %s672_s24 }
  0x24   : > { %352 = vrot.lane.b32.xlu2 %v289_v6, %s671_s23 }
  0x2c   : > { %408 = vrot.lane.b32.xlu2 %v289_v6, %s672_s24 }
  0x6e   : > { %v355_v10 = vpop.permute.xlu2 %354 }
  0x6f   : > { %v360_v22 = vsel %vm235_vm0, %v355_v10, 0 }
  0x70   : > { %369 = vmatpush.bf16.xpose.msrb.mxu1 %v360_v22 }
  0x76   : > { %v411_v11 = vpop.permute.xlu2 %410 }
  0x77   : > { %v416_v16 = vsel %vm235_vm0, %v411_v11, 0 }
  0x78   : > { %425 = vmatpush.bf16.xpose.msrb.mxu0 %v416_v16 }
  0x7e   : > { %v353_v15 = vpop.permute.xlu2 %352 }
  0x86   : > { %v409_v19 = vpop.permute.xlu2 %408 }
  0x87   : > { %597 = vmatmul.msk.bf16.vlgmr.msrb.gmra.mxu0 %vm235_vm0, %v409_v19 }
  0x95   : > { %v251_v7 = vpop.f32.mrf.mxu0 }
  0x96   : > { %v255_v8 = vsel %vm235_vm0, %v251_v7, -inf }
  0x97   : > { %256 = vmax.xlane.f32.xlu0 %v255_v8 }
  0x9d   : > { %v253_v9 = vpop.f32.mrf.mxu0 }
  0xab   : > { %295 = vrot.lane.b32.xlu0 %v294_v4, %s673_s25 }
 0x104   : > { %v427_v29 = vpop.f32.mrf.mxu0 }
 0x105   : > { %v431_v30 = vsel %vm235_vm0, %v427_v29, -inf }
 0x10a   : > { %v257_v12 = vpop.xlane.xlu0 %256 }
 0x10b   : > { %v258_v13 = vsub.f32 %v251_v7, %v257_v12 }
 0x10c   : > { %v429_v31 = vpop.f32.mrf.mxu0 }
 0x10d   : > { %v259_v14 = vmul.f32 1.442695, %v258_v13 }
 0x10f   : > { %631 = vpow2.f32 %v259_v14 }
 0x115   : > { %v632_v17 = vpop.eup %631 }
 0x116   : > { %v261_v18 = vsel %vm235_vm0, %v632_v17, 0.0 }
 0x117   : > { %262 = vadd.xlane.f32.xlu1 %v261_v18 }
 0x11d   : > { %v296_v23 = vpop.permute.xlu0 %295 }
 0x11e   : > { %v301_v24 = vsel %vm235_vm0, %v296_v23, 0 }
 0x11f   : > { %310 = vmatpush.bf16.xpose.msra.mxu2 %v301_v24 }
 0x130   : > { %290 = vrot.lane.b32.xlu1 %v289_v6, %s673_s25 }
 0x15a   : > { %432 = vmax.xlane.f32.xlu1 %v431_v30 }
 0x18a   : > { %v263_v25 = vpop.xlane.xlu1 %262 }
 0x18b   : > { %633 = vrcp.f32 %v263_v25 }
 0x191   : > { %v634_v26 = vpop.eup %633 }
 0x192   : > { %v265_v27 = vmul.f32 %v634_v26, %v632_v17 }
 0x194   : > { %v266_v28 = vpack.c.bf16 %v265_v27, %v265_v27 }
 0x196   : > { %592 = vmatmul.msk.bf16.vlgmr.msra.gmra.mxu1 %vm235_vm0, %v266_v28 }
 0x1a2   : > { %v291_v32 = vpop.permute.xlu1 %290 }
 0x1a3   : > { %593 = vmatmul.msk.bf16.vlgmr.msra.gmra.mxu2 %vm235_vm0, %v291_v32 }
 0x1a6   : > { %595 = vmatmul.msk.bf16.vlgmr.msrb.gmra.mxu1 %vm235_vm0, %v353_v15 }
 0x1cd   : > { %v433_v45 = vpop.xlane.xlu1 %432 }
 0x1ce   : > { %v434_v49 = vsub.f32 %v427_v29, %v433_v45 }
 0x1d0   : > { %v435_v51 = vmul.f32 1.442695, %v434_v49 }
 0x213   : > { %v748_v33 = vpop.f32.mrf.mxu1 }
 0x21b   : > { %v285_v34 = vpop.f32.mrf.mxu1 }
 0x223   : > { %v371_v35 = vpop.f32.mrf.mxu1 }
 0x224   : > { %v375_v36 = vsel %vm235_vm0, %v371_v35, -inf }
 0x225   : > { %376 = vmax.xlane.f32.xlu2 %v375_v36 }
 0x226   : > { %v312_v37 = vpop.f32.mrf.mxu2 }
 0x227   : > { %v316_v38 = vsel %vm235_vm0, %v312_v37, -inf }
 0x228   : > { %317 = vmax.xlane.f32.xlu0 %v316_v38 }
 0x22b   : > { %v373_v39 = vpop.f32.mrf.mxu1 }
 0x22e   : > { %v314_v40 = vpop.f32.mrf.mxu2 }
 0x23d   : > { %331 = vrot.lane.b32.xlu2 %v330_v42, %s673_s25 }
 0x298   : > { %v377_v43 = vpop.xlane.xlu2 %376 }
 0x299   : > { %v378_v44 = vsub.f32 %v371_v35, %v377_v43 }
 0x29b   : > { %v379_v46 = vmul.f32 1.442695, %v378_v44  ;;  %v318_v47 = vpop.xlane.xlu0 %317 }
 0x29c   : > { %v319_v48 = vsub.f32 %v312_v37, %v318_v47 }
 0x29d   : > { %635 = vpow2.f32 %v379_v46 }
 0x29e   : > { %v320_v50 = vmul.f32 1.442695, %v319_v48 }
 0x2a0   : > { %637 = vpow2.f32 %v320_v50  ;;  %v332_v58 = vpop.permute.xlu2 %331 }
 0x2a1   : > { %639 = vpow2.f32 %v435_v51  ;;  %v337_v59 = vsel %vm270_vm1, %v332_v58, 0 }
 0x2a2   : > { %346 = vmatpush.bf16.msra.mxu3 %v337_v59 }
 0x2a3   : > { %v636_v52 = vpop.eup %635 }
 0x2a4   : > { %v381_v53 = vsel %vm235_vm0, %v636_v52, 0.0 }
 0x2a5   : > { %382 = vadd.xlane.f32.xlu1 %v381_v53 }
 0x2a6   : > { %v638_v54 = vpop.eup %637 }
 0x2a7   : > { %v322_v55 = vsel %vm235_vm0, %v638_v54, 0.0  ;;  %v640_v56 = vpop.eup %639 }
 0x2a8   : > { %323 = vadd.xlane.f32.xlu0 %v322_v55  ;;  %v437_v57 = vsel %vm235_vm0, %v640_v56, 0.0 }
 0x2b0   : > { %438 = vadd.xlane.f32.xlu0 %v437_v57 }
 0x2be   : > { %387 = vrot.lane.b32.xlu1 %v330_v42, %s671_s23 }
 0x2c4   : > { %443 = vrot.lane.b32.xlu0 %v330_v42, %s672_s24 }
 0x318   : > { %v383_v63 = vpop.xlane.xlu1 %382 }
 0x31b   : > { %v324_v60 = vpop.xlane.xlu0 %323 }
 0x31c   : > { %641 = vrcp.f32 %v324_v60 }
 0x31d   : > { %643 = vrcp.f32 %v383_v63 }
 0x322   : > { %v642_v61 = vpop.eup %641 }
 0x323   : > { %v326_v62 = vmul.f32 %v642_v61, %v638_v54  ;;  %v439_v1 = vpop.xlane.xlu0 %438  ;;  %v644_v2 = vpop.eup %643 }
 0x324   : > { %645 = vrcp.f32 %v439_v1  ;;  %v385_v4 = vmul.f32 %v644_v2, %v636_v52 }
 0x325   : > { %v327_v0 = vpack.c.bf16 %v326_v62, %v326_v62 }
 0x326   : > { %v386_v8 = vpack.c.bf16 %v385_v4, %v385_v4 }
 0x327   : > { %594 = vmatmul.msk.bf16.vlgmr.msra.gmra.mxu3 %vm235_vm0, %v327_v0 }
 0x32a   : > { %v646_v6 = vpop.eup %645 }
 0x32b   : > { %v441_v7 = vmul.f32 %v646_v6, %v640_v56 }
 0x32d   : > { %v442_v11 = vpack.c.bf16 %v441_v7, %v441_v7 }
 0x330   : > { %v388_v3 = vpop.permute.xlu1 %387 }
 0x331   : > { %v393_v5 = vsel %vm270_vm1, %v388_v3, 0 }
 0x332   : > { %402 = vmatpush.bf16.msrb.mxu3 %v393_v5 }
 0x336   : > { %v444_v9 = vpop.permute.xlu0 %443 }
 0x337   : > { %596 = vmatmul.msk.bf16.vlgmr.msrb.gmra.mxu3 %vm235_vm0, %v386_v8  ;;  %v449_v10 = vsel %vm270_vm1, %v444_v9, 0 }
 0x338   : > { %458 = vmatpush.bf16.msrb.mxu2 %v449_v10 }
 0x33b   : > { %598 = vmatmul.msk.bf16.vlgmr.msrb.gmra.mxu2 %vm235_vm0, %v442_v11 }
 0x3aa   : > { %v348_v12 = vpop.f32.mrf.mxu3 }
 0x3ab   : > { %465 = vrot.lane.b32.xlu2 %v348_v12, %s674_s29 }
 0x3b2   : > { %v350_v13 = vpop.f32.mrf.mxu3 }
 0x3ba   : > { %v404_v14 = vpop.f32.mrf.mxu3 }
 0x3bb   : > { %469 = vrot.lane.b32.xlu2 %v404_v14, %s675_s30 }
 0x3be   : > { %v460_v15 = vpop.f32.mrf.mxu2 }
 0x3bf   : > { %473 = vrot.lane.b32.xlu0 %v460_v15, %s676_s4 }
 0x3c2   : > { %v406_v16 = vpop.f32.mrf.mxu3 }
 0x3c6   : > { %v462_v17 = vpop.f32.mrf.mxu2 }
 0x405   : > { %v466_v18 = vpop.permute.xlu2 %465 }
 0x406   : > { %v476_v20 = vsel %vm235_vm0, %v748_v33, %v466_v18 }
 0x415   : > { %v470_v19 = vpop.permute.xlu2 %469 }
 0x416   : > { %v478_v21 = vsel %vm477_vm2, %v476_v20, %v470_v19 }
 0x431   : > { %v474_v22 = vpop.permute.xlu0 %473 }
 0x432   : > { %v480_v23 = vsel %vm479_vm3, %v478_v21, %v474_v22 }
 0x433   : > { %v481_v24 = vpack.c.bf16 %v480_v23, %v480_v23 }
 0x435   : > { %483 = vst.msk [vmem:[%s230_s7] sm:$0xf] %vm482_vm4, %v481_v24 }
 0x436 PF: > { %s13_s14 = sadd.s32 1, %s669_s14   ;;  %s783_s12 = smov %s665_s13 }
 0x437   : > { %p10_p5 = scmp.ge.s32.totalorder %s13_s14, 4   ;;  %s784_s13 = smov %s786_s15 }
 0x439   :  { %12 = sbr.rel (!%p10_p5) target bundleno = 2 (0x2), region = 68 }

</bundles_post_ra>
